<compile_context>
chip_gen: v7x
topology: tpu7x:2x2x1
jax: 0.10.0
libtpu: 0.0.40
codegen_flags: <defaults>
</compile_context>

<pallas_src>
import functools

import jax
import jax.numpy as jnp
from jax import lax
from jax.experimental import pallas as pl
from jax.experimental.pallas import tpu as pltpu

VMEM_SPEC = pl.BlockSpec(memory_space=pltpu.MemorySpace.VMEM)


def _round_up(x, m):
    return (x + m - 1) // m * m


# ---------------------------------------------------------------------------
# Kernel 1: char CNN  Conv1d(Ec -> F, kernel=2) + max over conv positions
#   input  x: [T, Nt, 2*Ec]  (T = C-1 taps, leading axis -> free per-tap reads)
#   weight w: [2*Ec, F]      (stacked [w0; w1])
# ---------------------------------------------------------------------------
def _char_cnn_kernel(x_ref, w_ref, b_ref, o_ref):
    T = x_ref.shape[0]
    w = w_ref[...]
    acc = jnp.dot(x_ref[0], w, preferred_element_type=jnp.float32)
    for t in range(1, T):                         # static, small unroll over taps
        acc = jnp.maximum(acc, jnp.dot(x_ref[t], w, preferred_element_type=jnp.float32))
    o_ref[...] = acc + b_ref[...]                 # bias is max-invariant -> add once


def char_cnn(win, w, b, *, n_tile=512):
    # win: [T, N, 2*Ec]  ->  [N, F]
    T, N, E2 = win.shape
    F = w.shape[1]
    Nt = min(n_tile, _round_up(N, 8))
    Np = _round_up(N, Nt)
    if Np != N:
        win = jnp.pad(win, ((0, 0), (0, Np - N), (0, 0)))
    out = pl.pallas_call(
        _char_cnn_kernel,
        out_shape=jax.ShapeDtypeStruct((Np, F), jnp.float32),
        grid_spec=pltpu.PrefetchScalarGridSpec(
            num_scalar_prefetch=0,
            grid=(Np // Nt,),
            in_specs=[pl.BlockSpec((T, Nt, E2), lambda i: (0, i, 0)),
                      pl.BlockSpec((E2, F), lambda i: (0, 0)),
                      pl.BlockSpec((1, F), lambda i: (0, 0))],
            out_specs=pl.BlockSpec((Nt, F), lambda i: (i, 0))),
        compiler_params=pltpu.CompilerParams(dimension_semantics=("parallel",)),
    )(win, w, b.reshape(1, F))
    return out[:N]


# ---------------------------------------------------------------------------
# Kernel 2: hoisted LSTM input projection (both directions at once)
#   gates = x[S*B, F] @ Wih[F, 8H] + b[1, 8H]   — one big matmul, row-tiled grid
# ---------------------------------------------------------------------------
def _proj_kernel(x_ref, w_ref, b_ref, o_ref):
    o_ref[...] = (jnp.dot(x_ref[...], w_ref[...], preferred_element_type=jnp.float32)
                  + b_ref[...])


def input_projection(x, w, b, *, row_tile=512):
    R, F = x.shape
    G = w.shape[1]
    Rt = min(row_tile, _round_up(R, 8))
    Rp = _round_up(R, Rt)
    if Rp != R:
        x = jnp.pad(x, ((0, Rp - R), (0, 0)))
    out = pl.pallas_call(
        _proj_kernel,
        out_shape=jax.ShapeDtypeStruct((Rp, G), jnp.float32),
        grid_spec=pltpu.PrefetchScalarGridSpec(
            num_scalar_prefetch=0,
            grid=(Rp // Rt,),
            in_specs=[pl.BlockSpec((Rt, F), lambda i: (i, 0)),
                      pl.BlockSpec((F, G), lambda i: (0, 0)),
                      pl.BlockSpec((1, G), lambda i: (0, 0))],
            out_specs=pl.BlockSpec((Rt, G), lambda i: (i, 0))),
        compiler_params=pltpu.CompilerParams(dimension_semantics=("parallel",)),
    )(x, w, b.reshape(1, G))
    return out[:R]


# ---------------------------------------------------------------------------
# Kernel 3: fused bi-LSTM recurrence (fwd + bwd interleaved) + final Linear
#   gates: [S, B, 8H] (precomputed x@Wih + b, fwd gates then bwd gates)
#   whh_f/whh_b: [H, 4H]   fcw_f/fcw_b: [H, Kp]   fcb: [1, Kp]
#   output logits (lane-dense, padded classes): [S, B, Kp]
# ---------------------------------------------------------------------------
def _bilstm_fc_kernel(gates_ref, whh_f_ref, whh_b_ref,
                      fcw_f_ref, fcw_b_ref, fcb_ref,
                      o_ref, hsf_scr, hsb_scr):
    S, B, _ = gates_ref.shape
    H = whh_f_ref.shape[0]

    whh_f = whh_f_ref[...]
    whh_b = whh_b_ref[...]

    def cell(z, h, c, whh):
        zz = z + jnp.dot(h, whh, preferred_element_type=jnp.float32)   # [B, 4H]
        s = jax.nn.sigmoid(zz)                    # one full-vreg sigmoid (i, f, o)
        i = s[:, 0 * H:1 * H]
        f = s[:, 1 * H:2 * H]
        o = s[:, 3 * H:4 * H]
        g = jnp.tanh(zz[:, 2 * H:3 * H])          # tanh only on the g slice
        c_new = f * c + i * g
        h_new = o * jnp.tanh(c_new)
        return h_new, c_new

    def step(t, carry):
        hf, cf, hb, cb = carry
        # forward direction at time t
        zf = gates_ref[t][:, 0:4 * H]
        hf, cf = cell(zf, hf, cf, whh_f)
        hsf_scr[t] = hf
        # backward direction at time S-1-t (interleaved for ILP)
        tb = S - 1 - t
        zb = gates_ref[tb][:, 4 * H:8 * H]
        hb, cb = cell(zb, hb, cb, whh_b)
        hsb_scr[tb] = hb
        return (hf, cf, hb, cb)

    zero = jnp.zeros((B, H), jnp.float32)
    lax.fori_loop(0, S, step, (zero, zero, zero, zero))

    # fused FC epilogue: logits[t] = h_fwd[t] @ Wf + h_bwd[t] @ Wb + b
    fcw_f = fcw_f_ref[...]
    fcw_b = fcw_b_ref[...]
    fcb = fcb_ref[...]

    def fc_step(t, carry):
        o_ref[t] = (jnp.dot(hsf_scr[t], fcw_f, preferred_element_type=jnp.float32)
                    + jnp.dot(hsb_scr[t], fcw_b, preferred_element_type=jnp.float32)
                    + fcb)
        return carry

    lax.fori_loop(0, S, fc_step, 0)


def bilstm_fc(gates_tm, whh_f, whh_b, fcw_f, fcw_b, fcb):
    S, B, _ = gates_tm.shape
    H = whh_f.shape[0]
    Kp = fcw_f.shape[1]
    return pl.pallas_call(
        _bilstm_fc_kernel,
        out_shape=jax.ShapeDtypeStruct((S, B, Kp), jnp.float32),
        in_specs=[VMEM_SPEC] * 6,
        out_specs=VMEM_SPEC,
        scratch_shapes=[pltpu.VMEM((S, B, H), jnp.float32),
                        pltpu.VMEM((S, B, H), jnp.float32)],
    )(gates_tm, whh_f, whh_b, fcw_f, fcw_b, fcb)


# ---------------------------------------------------------------------------
# SeqTagger forward (CNN-biLSTM)
# ---------------------------------------------------------------------------
def seq_tagger_forward(params, batch, batch_char):
    B, S = batch.shape
    C = batch_char.shape[-1]
    H = params['whh_f'].shape[0]
    num_class = params['fc_w'].shape[1]
    if C < 2:
        raise ValueError("Conv1d(kernel_size=2) requires at least 2 char positions")

    # --- embedding gathers (glue) ---
    tok = params['embeddings'][batch]                        # [B, S, 300]
    ch = params['char_embedding'][batch_char]                # [B, S, C, 25]

    # --- char CNN: sliding windows, tap-major, token rows in (s, b) order ---
    win = jnp.concatenate([ch[:, :, :-1, :], ch[:, :, 1:, :]], axis=-1)   # [B,S,T,50]
    T = C - 1
    win = jnp.transpose(win, (2, 1, 0, 3)).reshape(T, S * B, -1)          # [T, S*B, 50]
    w_c = jnp.concatenate([params['cnn_w0'], params['cnn_w1']], axis=0)   # [50, 15]
    char_feat = char_cnn(win, w_c, params['cnn_b'])          # [S*B, 15]  rows = (s, b)

    # --- features, time-major flattened ---
    tok_tm = jnp.transpose(tok, (1, 0, 2)).reshape(S * B, -1)             # [S*B, 300]
    feats = jnp.concatenate([tok_tm, char_feat], axis=-1)                 # [S*B, 315]

    # --- hoisted input projection for BOTH directions: one matmul ---
    wih = jnp.concatenate([params['wih_f'], params['wih_b']], axis=1)     # [315, 8H]
    bias = jnp.concatenate([params['b_f'], params['b_b']], axis=0)        # [8H]
    gates = input_projection(feats, wih, bias)               # [S*B, 8H]
    gates = gates.reshape(S, B, 8 * H)                        # metadata-only reshape

    # --- fused bi-LSTM recurrence + FC (lane-dense padded logits) ---
    Kp = _round_up(max(num_class, 1), 128)
    fcw_f = jnp.zeros((H, Kp), jnp.float32).at[:, :num_class].set(params['fc_w'][:H])
    fcw_b = jnp.zeros((H, Kp), jnp.float32).at[:, :num_class].set(params['fc_w'][H:])
    fcb = jnp.zeros((1, Kp), jnp.float32).at[0, :num_class].set(params['fc_b'])
    logits_tm = bilstm_fc(gates, params['whh_f'], params['whh_b'],
                          fcw_f, fcw_b, fcb)                 # [S, B, Kp]

    logits = jnp.transpose(logits_tm, (1, 0, 2))[:, :, :num_class]        # [B, S, K]
    return logits


# ---------------------------------------------------------------------------
# Pure-JAX reference (same math) for correctness check
# ---------------------------------------------------------------------------
def reference_forward(params, batch, batch_char):
    tok = params['embeddings'][batch]
    chars = params['char_embedding'][batch_char]             # [B, S, C, Ec]
    left, right = chars[:, :, :-1, :], chars[:, :, 1:, :]
    conv = (jnp.einsum('bsce,ef->bscf', left, params['cnn_w0'])
            + jnp.einsum('bsce,ef->bscf', right, params['cnn_w1'])
            + params['cnn_b'])
    char_feat = conv.max(axis=2)
    feats = jnp.concatenate([tok, char_feat], axis=-1)

    def run_lstm(x, wih, whh, b):
        Bn, H = x.shape[0], whh.shape[0]

        def step(carry, x_t):
            h, c = carry
            gates = x_t @ wih + h @ whh + b
            i = jax.nn.sigmoid(gates[:, :H])
            f = jax.nn.sigmoid(gates[:, H:2 * H])
            g = jnp.tanh(gates[:, 2 * H:3 * H])
            o = jax.nn.sigmoid(gates[:, 3 * H:])
            c = f * c + i * g
            h = o * jnp.tanh(c)
            return (h, c), h

        init = (jnp.zeros((Bn, H), jnp.float32), jnp.zeros((Bn, H), jnp.float32))
        _, hs = lax.scan(step, init, jnp.transpose(x, (1, 0, 2)))
        return jnp.transpose(hs, (1, 0, 2))

    hf = run_lstm(feats, params['wih_f'], params['whh_f'], params['b_f'])
    hb = run_lstm(feats[:, ::-1], params['wih_b'], params['whh_b'], params['b_b'])[:, ::-1]
    out = jnp.concatenate([hf, hb], axis=-1)
    return out @ params['fc_w'] + params['fc_b']


# ---------------------------------------------------------------------------
# Deterministic parameter init
# ---------------------------------------------------------------------------
def init_params(key, vocab, char_vocab, d_tok=300, d_char=25, cnn_f=15, H=32, num_class=9):
    ks = jax.random.split(key, 12)
    s = 0.1
    F = d_tok + cnn_f
    p = {
        'embeddings':     jax.random.normal(ks[0], (vocab, d_tok), jnp.float32) * s,
        'char_embedding': jax.random.normal(ks[1], (char_vocab, d_char), jnp.float32) * s,
        # Conv1d(25, 15, 2): torch weight [15, 25, 2] -> two [25, 15] matrices
        'cnn_w0': jax.random.normal(ks[2], (d_char, cnn_f), jnp.float32) * s,
        'cnn_w1': jax.random.normal(ks[3], (d_char, cnn_f), jnp.float32) * s,
        'cnn_b':  jax.random.normal(ks[4], (cnn_f,), jnp.float32) * s,
        # LSTM (1 layer, bidirectional), gate order i,f,g,o; bias = bias_ih + bias_hh folded
        'wih_f': jax.random.normal(ks[5], (F, 4 * H), jnp.float32) * s,
        'whh_f': jax.random.normal(ks[6], (H, 4 * H), jnp.float32) * s,
        'b_f':   jax.random.normal(ks[7], (4 * H,), jnp.float32) * s,
        'wih_b': jax.random.normal(ks[8], (F, 4 * H), jnp.float32) * s,
        'whh_b': jax.random.normal(ks[9], (H, 4 * H), jnp.float32) * s,
        'b_b':   jax.random.normal(ks[10], (4 * H,), jnp.float32) * s,
        # fc: Linear(2H, num_class)
        'fc_w': jax.random.normal(ks[11], (2 * H, num_class), jnp.float32) * s,
        'fc_b': jnp.zeros((num_class,), jnp.float32),
    }
    return p


if __name__ == "__main__":
    B, S, C = 2, 8, 6
    vocab, char_vocab, num_class, H = 50, 30, 9, 32

    key = jax.random.PRNGKey(0)
    kp, kb, kc = jax.random.split(key, 3)
    params = init_params(kp, vocab, char_vocab, H=H, num_class=num_class)

    batch = jax.random.randint(kb, (B, S), 0, vocab, dtype=jnp.int32)
    batch_char = jax.random.randint(kc, (B, S, C), 0, char_vocab, dtype=jnp.int32)

    fwd = jax.jit(seq_tagger_forward)
    logits = jax.block_until_ready(fwd(params, batch, batch_char))

    ref = reference_forward(params, batch, batch_char)
    assert logits.shape == (B, S, num_class), logits.shape
    assert jnp.allclose(logits, ref, rtol=1e-2, atol=1e-2), \
        float(jnp.max(jnp.abs(logits - ref)))

    # TODO(synk): dropout is an inference no-op (num_layers=1); embedding gathers,
    # window build, concat and transposes stay in plain-JAX glue.
    print("KERNEL_OK")
</pallas_src>

<mosaic_0001>
module attributes {stable_mosaic.version = 11 : i64} {
  func.func @_char_cnn_kernel(%arg0: i32, %arg1: memref<5x16x50xf32, #tpu.memory_space<vmem>>, %arg2: memref<50x15xf32, #tpu.memory_space<vmem>>, %arg3: memref<1x15xf32, #tpu.memory_space<vmem>>, %arg4: memref<16x15xf32, #tpu.memory_space<vmem>>) attributes {dimension_semantics = [#tpu.dimension_semantics<parallel>], iteration_bounds = array<i64: 1>, scalar_prefetch = 0 : i64, scratch_operands = 0 : i64, tpu.core_type = #tpu.core_type<tc>, window_params = [{transform_indices = @transform_0, window_bounds = array<i64: 5, 16, 50>}, {pipeline_mode = #tpu.pipeline_mode<synchronous>, transform_indices = @transform_1, window_bounds = array<i64: 50, 15>}, {pipeline_mode = #tpu.pipeline_mode<synchronous>, transform_indices = @transform_2, window_bounds = array<i64: 1, 15>}, {transform_indices = @transform_3, window_bounds = array<i64: 16, 15>}]} {
    %c0 = arith.constant 0 : index
    %c0_0 = arith.constant 0 : index
    %0 = vector.load %arg2[%c0, %c0_0] : memref<50x15xf32, #tpu.memory_space<vmem>>, vector<50x15xf32>
    %c0_1 = arith.constant 0 : index
    %c0_2 = arith.constant 0 : index
    %c0_3 = arith.constant 0 : index
    %1 = vector.load %arg1[%c0_1, %c0_2, %c0_3] : memref<5x16x50xf32, #tpu.memory_space<vmem>>, vector<1x16x50xf32>
    %2 = vector.shape_cast %1 : vector<1x16x50xf32> to vector<16x50xf32>
    %cst = arith.constant dense<0.000000e+00> : vector<16x15xf32>
    %3 = tpu.matmul %2, %0, %cst {dimension_numbers = #tpu.dot_dimension_numbers<[1], [0], [0], [1], [0, 0, 1, 1], [], []>} : vector<16x50xf32>, vector<50x15xf32>, vector<16x15xf32> -> vector<16x15xf32>
    %c1 = arith.constant 1 : index
    %c0_4 = arith.constant 0 : index
    %c0_5 = arith.constant 0 : index
    %4 = vector.load %arg1[%c1, %c0_4, %c0_5] : memref<5x16x50xf32, #tpu.memory_space<vmem>>, vector<1x16x50xf32>
    %5 = vector.shape_cast %4 : vector<1x16x50xf32> to vector<16x50xf32>
    %cst_6 = arith.constant dense<0.000000e+00> : vector<16x15xf32>
    %6 = tpu.matmul %5, %0, %cst_6 {dimension_numbers = #tpu.dot_dimension_numbers<[1], [0], [0], [1], [0, 0, 1, 1], [], []>} : vector<16x50xf32>, vector<50x15xf32>, vector<16x15xf32> -> vector<16x15xf32>
    %7 = arith.maximumf %3, %6 : vector<16x15xf32>
    %c2 = arith.constant 2 : index
    %c0_7 = arith.constant 0 : index
    %c0_8 = arith.constant 0 : index
    %8 = vector.load %arg1[%c2, %c0_7, %c0_8] : memref<5x16x50xf32, #tpu.memory_space<vmem>>, vector<1x16x50xf32>
    %9 = vector.shape_cast %8 : vector<1x16x50xf32> to vector<16x50xf32>
    %cst_9 = arith.constant dense<0.000000e+00> : vector<16x15xf32>
    %10 = tpu.matmul %9, %0, %cst_9 {dimension_numbers = #tpu.dot_dimension_numbers<[1], [0], [0], [1], [0, 0, 1, 1], [], []>} : vector<16x50xf32>, vector<50x15xf32>, vector<16x15xf32> -> vector<16x15xf32>
    %11 = arith.maximumf %7, %10 : vector<16x15xf32>
    %c3 = arith.constant 3 : index
    %c0_10 = arith.constant 0 : index
    %c0_11 = arith.constant 0 : index
    %12 = vector.load %arg1[%c3, %c0_10, %c0_11] : memref<5x16x50xf32, #tpu.memory_space<vmem>>, vector<1x16x50xf32>
    %13 = vector.shape_cast %12 : vector<1x16x50xf32> to vector<16x50xf32>
    %cst_12 = arith.constant dense<0.000000e+00> : vector<16x15xf32>
    %14 = tpu.matmul %13, %0, %cst_12 {dimension_numbers = #tpu.dot_dimension_numbers<[1], [0], [0], [1], [0, 0, 1, 1], [], []>} : vector<16x50xf32>, vector<50x15xf32>, vector<16x15xf32> -> vector<16x15xf32>
    %15 = arith.maximumf %11, %14 : vector<16x15xf32>
    %c4 = arith.constant 4 : index
    %c0_13 = arith.constant 0 : index
    %c0_14 = arith.constant 0 : index
    %16 = vector.load %arg1[%c4, %c0_13, %c0_14] : memref<5x16x50xf32, #tpu.memory_space<vmem>>, vector<1x16x50xf32>
    %17 = vector.shape_cast %16 : vector<1x16x50xf32> to vector<16x50xf32>
    %cst_15 = arith.constant dense<0.000000e+00> : vector<16x15xf32>
    %18 = tpu.matmul %17, %0, %cst_15 {dimension_numbers = #tpu.dot_dimension_numbers<[1], [0], [0], [1], [0, 0, 1, 1], [], []>} : vector<16x50xf32>, vector<50x15xf32>, vector<16x15xf32> -> vector<16x15xf32>
    %19 = arith.maximumf %15, %18 : vector<16x15xf32>
    %c0_16 = arith.constant 0 : index
    %c0_17 = arith.constant 0 : index
    %20 = vector.load %arg3[%c0_16, %c0_17] : memref<1x15xf32, #tpu.memory_space<vmem>>, vector<1x15xf32>
    %21 = vector.broadcast %20 : vector<1x15xf32> to vector<16x15xf32>
    %22 = arith.addf %19, %21 : vector<16x15xf32>
    %c0_18 = arith.constant 0 : index
    %c0_19 = arith.constant 0 : index
    %23 = vector.load %arg4[%c0_18, %c0_19] : memref<16x15xf32, #tpu.memory_space<vmem>>, vector<16x15xf32>
    tpu.vector_store %arg4[%c0_18, %c0_19], %22 {strides = array<i32>} : memref<16x15xf32, #tpu.memory_space<vmem>>, vector<16x15xf32>,
    return
  }
  func.func @transform_0(%arg0: i32) -> (i32, i32, i32) {
    %c0_i32 = arith.constant 0 : i32
    %c0_i32_0 = arith.constant 0 : i32
    %c0_i32_1 = arith.constant 0 : i32
    return %c0_i32, %arg0, %c0_i32_0 : i32, i32, i32
  }
  func.func @transform_1(%arg0: i32) -> (i32, i32) {
    %c0_i32 = arith.constant 0 : i32
    %c0_i32_0 = arith.constant 0 : i32
    %c0_i32_1 = arith.constant 0 : i32
    return %c0_i32, %c0_i32_0 : i32, i32
  }
  func.func @transform_2(%arg0: i32) -> (i32, i32) {
    %c0_i32 = arith.constant 0 : i32
    %c0_i32_0 = arith.constant 0 : i32
    %c0_i32_1 = arith.constant 0 : i32
    return %c0_i32, %c0_i32_0 : i32, i32
  }
  func.func @transform_3(%arg0: i32) -> (i32, i32) {
    %c0_i32 = arith.constant 0 : i32
    %c0_i32_0 = arith.constant 0 : i32
    return %arg0, %c0_i32 : i32, i32
  }
}

module attributes {stable_mosaic.version = 11 : i64} {
  func.func @_proj_kernel(%arg0: i32, %arg1: memref<16x315xf32, #tpu.memory_space<vmem>>, %arg2: memref<315x256xf32, #tpu.memory_space<vmem>>, %arg3: memref<1x256xf32, #tpu.memory_space<vmem>>, %arg4: memref<16x256xf32, #tpu.memory_space<vmem>>) attributes {dimension_semantics = [#tpu.dimension_semantics<parallel>], iteration_bounds = array<i64: 1>, scalar_prefetch = 0 : i64, scratch_operands = 0 : i64, tpu.core_type = #tpu.core_type<tc>, window_params = [{transform_indices = @transform_0, window_bounds = array<i64: 16, 315>}, {pipeline_mode = #tpu.pipeline_mode<synchronous>, transform_indices = @transform_1, window_bounds = array<i64: 315, 256>}, {pipeline_mode = #tpu.pipeline_mode<synchronous>, transform_indices = @transform_2, window_bounds = array<i64: 1, 256>}, {transform_indices = @transform_3, window_bounds = array<i64: 16, 256>}]} {
    %c0 = arith.constant 0 : index
    %c0_0 = arith.constant 0 : index
    %0 = vector.load %arg1[%c0, %c0_0] : memref<16x315xf32, #tpu.memory_space<vmem>>, vector<16x315xf32>
    %c0_1 = arith.constant 0 : index
    %c0_2 = arith.constant 0 : index
    %1 = vector.load %arg2[%c0_1, %c0_2] : memref<315x256xf32, #tpu.memory_space<vmem>>, vector<315x256xf32>
    %cst = arith.constant dense<0.000000e+00> : vector<16x256xf32>
    %2 = tpu.matmul %0, %1, %cst {dimension_numbers = #tpu.dot_dimension_numbers<[1], [0], [0], [1], [0, 0, 1, 1], [], []>} : vector<16x315xf32>, vector<315x256xf32>, vector<16x256xf32> -> vector<16x256xf32>
    %c0_3 = arith.constant 0 : index
    %c0_4 = arith.constant 0 : index
    %3 = vector.load %arg3[%c0_3, %c0_4] : memref<1x256xf32, #tpu.memory_space<vmem>>, vector<1x256xf32>
    %4 = vector.broadcast %3 : vector<1x256xf32> to vector<16x256xf32>
    %5 = arith.addf %2, %4 : vector<16x256xf32>
    %c0_5 = arith.constant 0 : index
    %c0_6 = arith.constant 0 : index
    %6 = vector.load %arg4[%c0_5, %c0_6] : memref<16x256xf32, #tpu.memory_space<vmem>>, vector<16x256xf32>
    tpu.vector_store %arg4[%c0_5, %c0_6], %5 {strides = array<i32>} : memref<16x256xf32, #tpu.memory_space<vmem>>, vector<16x256xf32>,
    return
  }
  func.func @transform_0(%arg0: i32) -> (i32, i32) {
    %c0_i32 = arith.constant 0 : i32
    %c0_i32_0 = arith.constant 0 : i32
    return %arg0, %c0_i32 : i32, i32
  }
  func.func @transform_1(%arg0: i32) -> (i32, i32) {
    %c0_i32 = arith.constant 0 : i32
    %c0_i32_0 = arith.constant 0 : i32
    %c0_i32_1 = arith.constant 0 : i32
    return %c0_i32, %c0_i32_0 : i32, i32
  }
  func.func @transform_2(%arg0: i32) -> (i32, i32) {
    %c0_i32 = arith.constant 0 : i32
    %c0_i32_0 = arith.constant 0 : i32
    %c0_i32_1 = arith.constant 0 : i32
    return %c0_i32, %c0_i32_0 : i32, i32
  }
  func.func @transform_3(%arg0: i32) -> (i32, i32) {
    %c0_i32 = arith.constant 0 : i32
    %c0_i32_0 = arith.constant 0 : i32
    return %arg0, %c0_i32 : i32, i32
  }
}

module attributes {stable_mosaic.version = 11 : i64} {
  func.func @_bilstm_fc_kernel(%arg0: memref<8x2x256xf32, #tpu.memory_space<vmem>>, %arg1: memref<32x128xf32, #tpu.memory_space<vmem>>, %arg2: memref<32x128xf32, #tpu.memory_space<vmem>>, %arg3: memref<32x128xf32, #tpu.memory_space<vmem>>, %arg4: memref<32x128xf32, #tpu.memory_space<vmem>>, %arg5: memref<1x128xf32, #tpu.memory_space<vmem>>, %arg6: memref<8x2x128xf32, #tpu.memory_space<vmem>>, %arg7: memref<8x2x32xf32, #tpu.memory_space<vmem>>, %arg8: memref<8x2x32xf32, #tpu.memory_space<vmem>>) attributes {dimension_semantics = [], scalar_prefetch = 0 : i64, scratch_operands = 2 : i64, tpu.core_type = #tpu.core_type<tc>} {
    %c0 = arith.constant 0 : index
    %c0_0 = arith.constant 0 : index
    %0 = vector.load %arg1[%c0, %c0_0] : memref<32x128xf32, #tpu.memory_space<vmem>>, vector<32x128xf32>
    %c0_1 = arith.constant 0 : index
    %c0_2 = arith.constant 0 : index
    %1 = vector.load %arg2[%c0_1, %c0_2] : memref<32x128xf32, #tpu.memory_space<vmem>>, vector<32x128xf32>
    %cst = arith.constant 0.000000e+00 : f32
    %2 = vector.broadcast %cst : f32 to vector<2x32xf32>
    %c0_i32 = arith.constant 0 : i32
    %c8_i32 = arith.constant 8 : i32
    %3 = arith.addi %c0_i32, %c8_i32 : i32
    %c1_i32 = arith.constant 1 : i32
    %4:4 = scf.for %arg9 = %c0_i32 to %3 step %c1_i32 iter_args(%arg10 = %2, %arg11 = %2, %arg12 = %2, %arg13 = %2) -> (vector<2x32xf32>, vector<2x32xf32>, vector<2x32xf32>, vector<2x32xf32>)  : i32 {
      %9 = arith.index_cast %arg9 : i32 to index
      %c0_14 = arith.constant 0 : index
      %c0_15 = arith.constant 0 : index
      %10 = vector.load %arg0[%9, %c0_14, %c0_15] : memref<8x2x256xf32, #tpu.memory_space<vmem>>, vector<1x2x256xf32>
      %11 = vector.shape_cast %10 : vector<1x2x256xf32> to vector<2x256xf32>
      %12 = vector.extract_strided_slice %11 {offsets = [0, 0], sizes = [2, 128], strides = [1, 1]} : vector<2x256xf32> to vector<2x128xf32>
      %cst_16 = arith.constant dense<0.000000e+00> : vector<2x128xf32>
      %13 = tpu.matmul %arg10, %0, %cst_16 {dimension_numbers = #tpu.dot_dimension_numbers<[1], [0], [0], [1], [0, 0, 1, 1], [], []>} : vector<2x32xf32>, vector<32x128xf32>, vector<2x128xf32> -> vector<2x128xf32>
      %14 = arith.addf %12, %13 : vector<2x128xf32>
      %15 = arith.negf %14 : vector<2x128xf32>
      %16 = math.exp %15 : vector<2x128xf32>
      %cst_17 = arith.constant 1.000000e+00 : f32
      %17 = vector.broadcast %cst_17 : f32 to vector<2x128xf32>
      %18 = arith.addf %17, %16 : vector<2x128xf32>
      %19 = arith.divf %17, %18 : vector<2x128xf32>
      %20 = vector.extract_strided_slice %19 {offsets = [0, 0], sizes = [2, 32], strides = [1, 1]} : vector<2x128xf32> to vector<2x32xf32>
      %21 = vector.extract_strided_slice %19 {offsets = [0, 32], sizes = [2, 32], strides = [1, 1]} : vector<2x128xf32> to vector<2x32xf32>
      %22 = vector.extract_strided_slice %19 {offsets = [0, 96], sizes = [2, 32], strides = [1, 1]} : vector<2x128xf32> to vector<2x32xf32>
      %23 = vector.extract_strided_slice %14 {offsets = [0, 64], sizes = [2, 32], strides = [1, 1]} : vector<2x128xf32> to vector<2x32xf32>
      %24 = math.tanh %23 : vector<2x32xf32>
      %25 = arith.mulf %21, %arg11 : vector<2x32xf32>
      %26 = arith.mulf %20, %24 : vector<2x32xf32>
      %27 = arith.addf %25, %26 : vector<2x32xf32>
      %28 = math.tanh %27 : vector<2x32xf32>
      %29 = arith.mulf %22, %28 : vector<2x32xf32>
      %30 = arith.index_cast %arg9 : i32 to index
      %c0_18 = arith.constant 0 : index
      %c0_19 = arith.constant 0 : index
      %31 = vector.load %arg7[%30, %c0_18, %c0_19] : memref<8x2x32xf32, #tpu.memory_space<vmem>>, vector<1x2x32xf32>
      %32 = vector.shape_cast %31 : vector<1x2x32xf32> to vector<2x32xf32>
      %33 = vector.shape_cast %29 : vector<2x32xf32> to vector<1x2x32xf32>
      tpu.vector_store %arg7[%30, %c0_18, %c0_19], %33 {strides = array<i32>} : memref<8x2x32xf32, #tpu.memory_space<vmem>>, vector<1x2x32xf32>,
      %c7_i32 = arith.constant 7 : i32
      %34 = arith.subi %c7_i32, %arg9 : i32
      %35 = arith.index_cast %34 : i32 to index
      %c0_20 = arith.constant 0 : index
      %c0_21 = arith.constant 0 : index
      %36 = vector.load %arg0[%35, %c0_20, %c0_21] : memref<8x2x256xf32, #tpu.memory_space<vmem>>, vector<1x2x256xf32>
      %37 = vector.shape_cast %36 : vector<1x2x256xf32> to vector<2x256xf32>
      %38 = vector.extract_strided_slice %37 {offsets = [0, 128], sizes = [2, 128], strides = [1, 1]} : vector<2x256xf32> to vector<2x128xf32>
      %cst_22 = arith.constant dense<0.000000e+00> : vector<2x128xf32>
      %39 = tpu.matmul %arg12, %1, %cst_22 {dimension_numbers = #tpu.dot_dimension_numbers<[1], [0], [0], [1], [0, 0, 1, 1], [], []>} : vector<2x32xf32>, vector<32x128xf32>, vector<2x128xf32> -> vector<2x128xf32>
      %40 = arith.addf %38, %39 : vector<2x128xf32>
      %41 = arith.negf %40 : vector<2x128xf32>
      %42 = math.exp %41 : vector<2x128xf32>
      %cst_23 = arith.constant 1.000000e+00 : f32
      %43 = vector.broadcast %cst_23 : f32 to vector<2x128xf32>
      %44 = arith.addf %43, %42 : vector<2x128xf32>
      %45 = arith.divf %43, %44 : vector<2x128xf32>
      %46 = vector.extract_strided_slice %45 {offsets = [0, 0], sizes = [2, 32], strides = [1, 1]} : vector<2x128xf32> to vector<2x32xf32>
      %47 = vector.extract_strided_slice %45 {offsets = [0, 32], sizes = [2, 32], strides = [1, 1]} : vector<2x128xf32> to vector<2x32xf32>
      %48 = vector.extract_strided_slice %45 {offsets = [0, 96], sizes = [2, 32], strides = [1, 1]} : vector<2x128xf32> to vector<2x32xf32>
      %49 = vector.extract_strided_slice %40 {offsets = [0, 64], sizes = [2, 32], strides = [1, 1]} : vector<2x128xf32> to vector<2x32xf32>
      %50 = math.tanh %49 : vector<2x32xf32>
      %51 = arith.mulf %47, %arg13 : vector<2x32xf32>
      %52 = arith.mulf %46, %50 : vector<2x32xf32>
      %53 = arith.addf %51, %52 : vector<2x32xf32>
      %54 = math.tanh %53 : vector<2x32xf32>
      %55 = arith.mulf %48, %54 : vector<2x32xf32>
      %56 = arith.index_cast %34 : i32 to index
      %c0_24 = arith.constant 0 : index
      %c0_25 = arith.constant 0 : index
      %57 = vector.load %arg8[%56, %c0_24, %c0_25] : memref<8x2x32xf32, #tpu.memory_space<vmem>>, vector<1x2x32xf32>
      %58 = vector.shape_cast %57 : vector<1x2x32xf32> to vector<2x32xf32>
      %59 = vector.shape_cast %55 : vector<2x32xf32> to vector<1x2x32xf32>
      tpu.vector_store %arg8[%56, %c0_24, %c0_25], %59 {strides = array<i32>} : memref<8x2x32xf32, #tpu.memory_space<vmem>>, vector<1x2x32xf32>,
      scf.yield %29, %27, %55, %53 : vector<2x32xf32>, vector<2x32xf32>, vector<2x32xf32>, vector<2x32xf32>
    }
    %c8_i32_3 = arith.constant 8 : i32
    %c0_4 = arith.constant 0 : index
    %c0_5 = arith.constant 0 : index
    %5 = vector.load %arg3[%c0_4, %c0_5] : memref<32x128xf32, #tpu.memory_space<vmem>>, vector<32x128xf32>
    %c0_6 = arith.constant 0 : index
    %c0_7 = arith.constant 0 : index
    %6 = vector.load %arg4[%c0_6, %c0_7] : memref<32x128xf32, #tpu.memory_space<vmem>>, vector<32x128xf32>
    %c0_8 = arith.constant 0 : index
    %c0_9 = arith.constant 0 : index
    %7 = vector.load %arg5[%c0_8, %c0_9] : memref<1x128xf32, #tpu.memory_space<vmem>>, vector<1x128xf32>
    %c0_i32_10 = arith.constant 0 : i32
    %c8_i32_11 = arith.constant 8 : i32
    %8 = arith.addi %c0_i32_10, %c8_i32_11 : i32
    %c1_i32_12 = arith.constant 1 : i32
    scf.for %arg9 = %c0_i32_10 to %8 step %c1_i32_12  : i32 {
      %9 = arith.index_cast %arg9 : i32 to index
      %c0_14 = arith.constant 0 : index
      %c0_15 = arith.constant 0 : index
      %10 = vector.load %arg7[%9, %c0_14, %c0_15] : memref<8x2x32xf32, #tpu.memory_space<vmem>>, vector<1x2x32xf32>
      %11 = vector.shape_cast %10 : vector<1x2x32xf32> to vector<2x32xf32>
      %cst_16 = arith.constant dense<0.000000e+00> : vector<2x128xf32>
      %12 = tpu.matmul %11, %5, %cst_16 {dimension_numbers = #tpu.dot_dimension_numbers<[1], [0], [0], [1], [0, 0, 1, 1], [], []>} : vector<2x32xf32>, vector<32x128xf32>, vector<2x128xf32> -> vector<2x128xf32>
      %13 = arith.index_cast %arg9 : i32 to index
      %c0_17 = arith.constant 0 : index
      %c0_18 = arith.constant 0 : index
      %14 = vector.load %arg8[%13, %c0_17, %c0_18] : memref<8x2x32xf32, #tpu.memory_space<vmem>>, vector<1x2x32xf32>
      %15 = vector.shape_cast %14 : vector<1x2x32xf32> to vector<2x32xf32>
      %cst_19 = arith.constant dense<0.000000e+00> : vector<2x128xf32>
      %16 = tpu.matmul %15, %6, %cst_19 {dimension_numbers = #tpu.dot_dimension_numbers<[1], [0], [0], [1], [0, 0, 1, 1], [], []>} : vector<2x32xf32>, vector<32x128xf32>, vector<2x128xf32> -> vector<2x128xf32>
      %17 = arith.addf %12, %16 : vector<2x128xf32>
      %18 = vector.broadcast %7 : vector<1x128xf32> to vector<2x128xf32>
      %19 = arith.addf %17, %18 : vector<2x128xf32>
      %20 = arith.index_cast %arg9 : i32 to index
      %c0_20 = arith.constant 0 : index
      %c0_21 = arith.constant 0 : index
      %21 = vector.load %arg6[%20, %c0_20, %c0_21] : memref<8x2x128xf32, #tpu.memory_space<vmem>>, vector<1x2x128xf32>
      %22 = vector.shape_cast %21 : vector<1x2x128xf32> to vector<2x128xf32>
      %23 = vector.shape_cast %19 : vector<2x128xf32> to vector<1x2x128xf32>
      tpu.vector_store %arg6[%20, %c0_20, %c0_21], %23 {strides = array<i32>} : memref<8x2x128xf32, #tpu.memory_space<vmem>>, vector<1x2x128xf32>,
    }
    %c8_i32_13 = arith.constant 8 : i32
    return
  }
}

</mosaic_0001>

<bundles_post_ra>
// kernel: seq_tagger_forward.3
= control target key start
LH: loop header
LB: loop body
LE: loop exit
PB: predicated region body
PF: predicated region fallthrough
CT: control target
= control target key end

     0   :  { %vm23_vm0 = vcmask 408576   ;;  %vm30_vm1 = vcmask 1041408   ;;  %vm462_vm2 = vcmask 121856   ;;  %s783_s1 = inlined_call_operand.vmem [shape: f32[50,15], index: 1, kind: input, shape index: {}]   ;;  %s784_s0 = inlined_call_operand.vmem [shape: f32[5,16,50], index: 0, kind: input, shape index: {}]   ;;  %s785_s2 = inlined_call_operand.vmem [shape: f32[1,15], index: 2, kind: input, shape index: {}]   ;;  %s786_s3 = inlined_call_operand.vmem [shape: f32[16,15], index: 3, kind: output, shape index: {}]  }
   0x1   :  { %v14_v0 = vld [vmem:[%s783_s1] sm:$0xff]  ;;  %v15_v1 = vld [vmem:[%s783_s1 + $0x8] sm:$0xff]  ;;  %v16_v2 = vld [vmem:[%s783_s1 + $0x10] sm:$0xff] }
   0x2   :  { %v623_v3 = vpack.c.bf16 %v15_v1, %v14_v0  ;;  %v17_v4 = vld [vmem:[%s783_s1 + $0x18] sm:$0xff]  ;;  %v18_v6 = vld [vmem:[%s783_s1 + $0x20] sm:$0xff]  ;;  %v19_v7 = vld [vmem:[%s783_s1 + $0x28] sm:$0xff] }
   0x3   :  { %v627_v5 = vpack.c.bf16 %v17_v4, %v16_v2  ;;  %v21_v8 = vld [vmem:[%s784_s0] sm:$0xff]  ;;  %v472_v9 = vld [vmem:[%s784_s0 + $0x10] sm:$0xff]  ;;  %v631_v10 = vpack.c.bf16 %v19_v7, %v18_v6  ;;  %v22_v12 = vld [vmem:[%s784_s0 + $0x8] sm:$0xff] }
   0x4   :  { %624 = vmatprep.subr.bf16.mxu0 %v623_v3  ;;  %636 = vmatprep.subr.bf16.mxu1 %v623_v3  ;;  %v20_v11 = vld [vmem:[%s783_s1 + $0x30] sm:$0x3]  ;;  %v473_v13 = vld [vmem:[%s784_s0 + $0x18] sm:$0xff]  ;;  %v477_v14 = vld [vmem:[%s784_s0 + $0x20] sm:$0xff] }
   0x5   :  { %626 = vmatpush3.bf16.msra.mxu0 %v623_v3  ;;  %638 = vmatpush3.bf16.msra.mxu1 %v623_v3  ;;  %v482_v15 = vld [vmem:[%s784_s0 + $0x30] sm:$0xff]  ;;  %v478_v16 = vld [vmem:[%s784_s0 + $0x28] sm:$0xff]  ;;  %v483_v17 = vld [vmem:[%s784_s0 + $0x38] sm:$0xff] }
   0x6   :  { %628 = vmatprep.subr.bf16.mxu0 %v627_v5  ;;  %640 = vmatprep.subr.bf16.mxu1 %v627_v5  ;;  %v487_v18 = vld [vmem:[%s784_s0 + $0x40] sm:$0xff]  ;;  %v488_v19 = vld [vmem:[%s784_s0 + $0x48] sm:$0xff] }
   0x7   :  { %552 = vmatprep.mubr.msk.f32.mxu0 %vm23_vm0, %v21_v8  ;;  %569 = vmatprep.mubr.msk.f32.mxu1 %vm23_vm0, %v472_v9  ;;  %v492_v35 = vld [vmem:[%s785_s2] ss:$0 sm:$0xff] }
   0x9   :  { %630 = vmatpush3.bf16.msra.mxu0 %v627_v5  ;;  %642 = vmatpush3.bf16.msra.mxu1 %v627_v5 }
   0xa   :  { %632 = vmatprep.subr.bf16.mxu0 %v631_v10  ;;  %644 = vmatprep.subr.bf16.mxu1 %v631_v10 }
   0xd   :  { %634 = vmatpush3.bf16.msra.mxu0 %v631_v10  ;;  %646 = vmatpush3.bf16.msra.mxu1 %v631_v10 }
   0xe   :  { %550 = vmatprep.subr.msk.mxu0 %vm30_vm1, %v20_v11  ;;  %567 = vmatprep.subr.msk.mxu1 %vm30_vm1, %v20_v11 }
  0x11   :  { %551 = vmatpush3.msk.msra.mxu0 %vm30_vm1, %v20_v11  ;;  %568 = vmatpush3.msk.msra.mxu1 %vm30_vm1, %v20_v11 }
  0x12   :  { %553 = vmatmul.mubr.msk.f32.vlgmr.msra.gmra.mrb[0].mxu0 %vm23_vm0, %v22_v12  ;;  %570 = vmatmul.mubr.msk.f32.vlgmr.msra.gmra.mrb[0].mxu1 %vm23_vm0, %v473_v13 }
  0x13   :  { %648 = vmatprep.subr.bf16.mxu0 %v623_v3  ;;  %660 = vmatprep.subr.bf16.mxu1 %v623_v3 }
  0x14   :  { %650 = vmatpush3.bf16.msra.mxu0 %v623_v3  ;;  %662 = vmatpush3.bf16.msra.mxu1 %v623_v3 }
  0x15   :  { %652 = vmatprep.subr.bf16.mxu0 %v627_v5  ;;  %664 = vmatprep.subr.bf16.mxu1 %v627_v5 }
  0x16   :  { %586 = vmatprep.mubr.msk.f32.mxu0 %vm23_vm0, %v477_v14  ;;  %603 = vmatprep.mubr.msk.f32.mxu1 %vm23_vm0, %v482_v15 }
  0x18   :  { %654 = vmatpush3.bf16.msra.mxu0 %v627_v5  ;;  %666 = vmatpush3.bf16.msra.mxu1 %v627_v5 }
  0x19   :  { %656 = vmatprep.subr.bf16.mxu0 %v631_v10  ;;  %668 = vmatprep.subr.bf16.mxu1 %v631_v10 }
  0x1c   :  { %658 = vmatpush3.bf16.msra.mxu0 %v631_v10  ;;  %670 = vmatpush3.bf16.msra.mxu1 %v631_v10 }
  0x1d   :  { %584 = vmatprep.subr.msk.mxu0 %vm30_vm1, %v20_v11  ;;  %601 = vmatprep.subr.msk.mxu1 %vm30_vm1, %v20_v11 }
  0x20   :  { %585 = vmatpush3.msk.msra.mxu0 %vm30_vm1, %v20_v11  ;;  %602 = vmatpush3.msk.msra.mxu1 %vm30_vm1, %v20_v11 }
  0x21   :  { %587 = vmatmul.mubr.msk.f32.vlgmr.msra.gmra.mrb[2].mxu0 %vm23_vm0, %v478_v16  ;;  %672 = vmatprep.subr.bf16.mxu0 %v623_v3 }
  0x22   :  { %674 = vmatpush3.bf16.msra.mxu0 %v623_v3  ;;  %604 = vmatmul.mubr.msk.f32.vlgmr.msra.gmra.mrb[2].mxu1 %vm23_vm0, %v483_v17 }
  0x23   :  { %676 = vmatprep.subr.bf16.mxu0 %v627_v5  ;;  %620 = vmatprep.mubr.msk.f32.mxu0 %vm23_vm0, %v487_v18 }
  0x26   :  { %678 = vmatpush3.bf16.msra.mxu0 %v627_v5 }
  0x27   :  { %680 = vmatprep.subr.bf16.mxu0 %v631_v10 }
  0x2a   :  { %682 = vmatpush3.bf16.msra.mxu0 %v631_v10 }
  0x2b   :  { %618 = vmatprep.subr.msk.mxu0 %vm30_vm1, %v20_v11 }
  0x2e   :  { %619 = vmatpush3.msk.msra.mxu0 %vm30_vm1, %v20_v11 }
  0x2f   :  { %621 = vmatmul.mubr.msk.f32.vlgmr.msra.gmra.mrb[4].mxu0 %vm23_vm0, %v488_v19 }
  0xe5   :  { %v554_v20 = vpop.f32.mrb[0].mxu0  ;;  %v571_v21 = vpop.f32.mrb[0].mxu1 }
  0xe6   :  { %v194_v22 = vmax.f32 %v554_v20, %v571_v21  ;;  %v100_v23 = vpop.f32.mrb[1].mxu0  ;;  %v184_v24 = vpop.f32.mrb[1].mxu1 }
  0xe7   :  { %v193_v25 = vmax.f32 %v100_v23, %v184_v24 }
  0xf4   :  { %v588_v26 = vpop.f32.mrb[2].mxu0 }
  0xf5   :  { %v280_v27 = vmax.f32 %v194_v22, %v588_v26  ;;  %v270_v28 = vpop.f32.mrb[3].mxu0  ;;  %v605_v29 = vpop.f32.mrb[2].mxu1 }
  0xf6   :  { %v279_v30 = vmax.f32 %v193_v25, %v270_v28  ;;  %v356_v31 = vpop.f32.mrb[3].mxu1 }
  0xf7   :  { %v366_v32 = vmax.f32 %v280_v27, %v605_v29 }
  0xf8   :  { %v365_v33 = vmax.f32 %v279_v30, %v356_v31 }
 0x102   :  { %v622_v34 = vpop.f32.mrb[4].mxu0 }
 0x103   :  { %v452_v36 = vmax.f32 %v366_v32, %v622_v34  ;;  %v442_v37 = vpop.f32.mrb[5].mxu0 }
 0x104   :  { %v451_v38 = vmax.f32 %v365_v33, %v442_v37 }
 0x105   :  { %v461_v39 = vadd.f32 %v492_v35, %v452_v36 }
 0x106   :  { %v460_v40 = vadd.f32 %v492_v35, %v451_v38 }
 0x107   :  { %464 = vst.msk [vmem:[%s786_s3 + $0x8] sm:$0xff] %vm462_vm2, %v461_v39 }
 0x108   :  { %463 = vst.msk [vmem:[%s786_s3] sm:$0xff] %vm462_vm2, %v460_v40 }

// kernel: seq_tagger_forward.4
= control target key start
LH: loop header
LB: loop body
LE: loop exit
PB: predicated region body
PF: predicated region fallthrough
CT: control target
= control target key end

     0   :  { %v384_v3 = vmov 0.0   ;;  %vm119_vm0 = vcmask 1042432   ;;  %vm385_vm1 = vmmov 1   ;;  %vm112_vm3 = vcmask 482304   ;;  %s692_s1 = inlined_call_operand.vmem [shape: f32[315,256], index: 1, kind: input, shape index: {}]   ;;  %s693_s0 = inlined_call_operand.vmem [shape: f32[16,315], index: 0, kind: input, shape index: {}]   ;;  %s694_s2 = inlined_call_operand.vmem [shape: f32[1,256], index: 2, kind: input, shape index: {}]   ;;  %s695_s3 = inlined_call_operand.vmem [shape: f32[16,256], index: 3, kind: output, shape index: {}]  }
   0x1   :  { %v21_v0 = vld [vmem:[%s692_s1 + $0x8] sm:$0xff]  ;;  %v23_v1 = vld [vmem:[%s692_s1 + $0x18] sm:$0xff]  ;;  %v20_v2 = vld [vmem:[%s692_s1] sm:$0xff]  ;;  %267 = vmatprep.mubr.f32.mxu0 %v384_v3 }
   0x2   :  { %v292_v4 = vpack.c.bf16 %v23_v1, %v21_v0  ;;  %v22_v5 = vld [vmem:[%s692_s1 + $0x10] sm:$0xff]  ;;  %v25_v6 = vld [vmem:[%s692_s1 + $0x28] sm:$0xff]  ;;  %v27_v7 = vld [vmem:[%s692_s1 + $0x38] sm:$0xff] }
   0x3   :  { %v294_v8 = vpack.c.bf16 %v22_v5, %v20_v2  ;;  %v296_v9 = vpack.c.bf16 %v27_v7, %v25_v6  ;;  %v24_v10 = vld [vmem:[%s692_s1 + $0x20] sm:$0xff]  ;;  %v26_v11 = vld [vmem:[%s692_s1 + $0x30] sm:$0xff]  ;;  %v29_v12 = vld [vmem:[%s692_s1 + $0x48] sm:$0xff] }
   0x4   :  { %293 = vmatprep.subr.bf16.mxu1 %v292_v4  ;;  %v31_v13 = vld [vmem:[%s692_s1 + $0x58] sm:$0xff]  ;;  %v298_v14 = vpack.c.bf16 %v26_v11, %v24_v10  ;;  %v28_v16 = vld [vmem:[%s692_s1 + $0x40] sm:$0xff]  ;;  %v30_v17 = vld [vmem:[%s692_s1 + $0x50] sm:$0xff] }
   0x5   :  { %295 = vmatpush1.bf16.msra.mxu1 %v294_v8  ;;  %v300_v15 = vpack.c.bf16 %v31_v13, %v29_v12  ;;  %v33_v18 = vld [vmem:[%s692_s1 + $0x68] sm:$0xff]  ;;  %v35_v19 = vld [vmem:[%s692_s1 + $0x78] sm:$0xff]  ;;  %v302_v20 = vpack.c.bf16 %v30_v17, %v28_v16  ;;  %v32_v22 = vld [vmem:[%s692_s1 + $0x60] sm:$0xff] }
   0x6   :  { %297 = vmatprep.subr.bf16.mxu1 %v296_v9  ;;  %v304_v21 = vpack.c.bf16 %v35_v19, %v33_v18  ;;  %v34_v23 = vld [vmem:[%s692_s1 + $0x70] sm:$0xff]  ;;  %v37_v24 = vld [vmem:[%s692_s1 + $0x88] sm:$0xff]  ;;  %v39_v25 = vld [vmem:[%s692_s1 + $0x98] sm:$0xff] }
   0x7   :  { %v306_v26 = vpack.c.bf16 %v34_v23, %v32_v22  ;;  %v308_v27 = vpack.c.bf16 %v39_v25, %v37_v24  ;;  %v36_v28 = vld [vmem:[%s692_s1 + $0x80] sm:$0xff]  ;;  %v38_v29 = vld [vmem:[%s692_s1 + $0x90] sm:$0xff]  ;;  %v41_v30 = vld [vmem:[%s692_s1 + $0xa8] sm:$0xff] }
   0x8   :  { %v43_v31 = vld [vmem:[%s692_s1 + $0xb8] sm:$0xff]  ;;  %v310_v32 = vpack.c.bf16 %v38_v29, %v36_v28  ;;  %v40_v33 = vld [vmem:[%s692_s1 + $0xa0] sm:$0xff]  ;;  %v42_v34 = vld [vmem:[%s692_s1 + $0xb0] sm:$0xff] }
   0x9   :  { %299 = vmatpush1.bf16.msra.mxu1 %v298_v14  ;;  %v312_v35 = vpack.c.bf16 %v43_v31, %v41_v30  ;;  %v45_v36 = vld [vmem:[%s692_s1 + $0xc8] sm:$0xff]  ;;  %v87_v38 = vld [vmem:[%s692_s1 + $0x218] sm:$0xff]  ;;  %v84_v41 = vld [vmem:[%s692_s1 + $0x200] sm:$0xff]  ;;  %v314_v44 = vpack.c.bf16 %v42_v34, %v40_v33 }
   0xa   :  { %301 = vmatprep.subr.bf16.mxu1 %v300_v15  ;;  %v85_v37 = vld [vmem:[%s692_s1 + $0x208] sm:$0xff]  ;;  %v47_v39 = vld [vmem:[%s692_s1 + $0xd8] sm:$0xff]  ;;  %v86_v42 = vld [vmem:[%s692_s1 + $0x210] sm:$0xff] }
   0xb   :  { %v356_v40 = vpack.c.bf16 %v87_v38, %v85_v37  ;;  %v358_v43 = vpack.c.bf16 %v86_v42, %v84_v41  ;;  %v89_v45 = vld [vmem:[%s692_s1 + $0x228] sm:$0xff]  ;;  %v91_v46 = vld [vmem:[%s692_s1 + $0x238] sm:$0xff]  ;;  %v88_v47 = vld [vmem:[%s692_s1 + $0x220] sm:$0xff]  ;;  %v316_v48 = vpack.c.bf16 %v47_v39, %v45_v36 }
   0xc   :  { %v44_v49 = vld [vmem:[%s692_s1 + $0xc0] sm:$0xff]  ;;  %v46_v50 = vld [vmem:[%s692_s1 + $0xd0] sm:$0xff]  ;;  %v360_v51 = vpack.c.bf16 %v91_v46, %v89_v45  ;;  %v49_v53 = vld [vmem:[%s692_s1 + $0xe8] sm:$0xff] }
   0xd   :  { %303 = vmatpush1.bf16.msra.mxu1 %v302_v20  ;;  %357 = vmatprep.subr.bf16.mxu0 %v356_v40  ;;  %v90_v52 = vld [vmem:[%s692_s1 + $0x230] sm:$0xff]  ;;  %v51_v54 = vld [vmem:[%s692_s1 + $0xf8] sm:$0xff]  ;;  %v93_v56 = vld [vmem:[%s692_s1 + $0x248] sm:$0xff]  ;;  %v318_v60 = vpack.c.bf16 %v46_v50, %v44_v49 }
   0xe   :  { %305 = vmatprep.subr.bf16.mxu1 %v304_v21  ;;  %359 = vmatpush1.bf16.msra.mxu0 %v358_v43  ;;  %v362_v55 = vpack.c.bf16 %v90_v52, %v88_v47  ;;  %v95_v57 = vld [vmem:[%s692_s1 + $0x258] sm:$0xff]  ;;  %v92_v58 = vld [vmem:[%s692_s1 + $0x240] sm:$0xff]  ;;  %v94_v59 = vld [vmem:[%s692_s1 + $0x250] sm:$0xff]  ;;  %v320_v0 = vpack.c.bf16 %v51_v54, %v49_v53 }
   0xf   :  { %361 = vmatprep.subr.bf16.mxu0 %v360_v51  ;;  %v48_v61 = vld [vmem:[%s692_s1 + $0xe0] sm:$0xff]  ;;  %v50_v62 = vld [vmem:[%s692_s1 + $0xf0] sm:$0xff]  ;;  %v364_v63 = vpack.c.bf16 %v95_v57, %v93_v56  ;;  %v53_v1 = vld [vmem:[%s692_s1 + $0x108] sm:$0xff]  ;;  %v366_v2 = vpack.c.bf16 %v94_v59, %v92_v58 }
  0x10   :  { %v97_v4 = vld [vmem:[%s692_s1 + $0x268] sm:$0xff]  ;;  %v99_v5 = vld [vmem:[%s692_s1 + $0x278] sm:$0x7]  ;;  %v96_v8 = vld [vmem:[%s692_s1 + $0x260] sm:$0xff]  ;;  %v322_v12 = vpack.c.bf16 %v50_v62, %v48_v61 }
  0x11   :  { %307 = vmatpush1.bf16.msra.mxu1 %v306_v26  ;;  %v55_v6 = vld [vmem:[%s692_s1 + $0x118] sm:$0xff]  ;;  %v368_v7 = vpack.c.bf16 %v99_v5, %v97_v4  ;;  %v98_v9 = vld [vmem:[%s692_s1 + $0x270] sm:$0x7]  ;;  %vm558_vm2 = vmpackc.low %vm119_vm0, %vm385_vm1  ;;  %v102_v5 = vlaneseq }
  0x12   :  { %309 = vmatprep.subr.bf16.mxu1 %v308_v27  ;;  %363 = vmatpush1.bf16.msra.mxu0 %v362_v55  ;;  %v15_v11 = vld [vmem:[%s693_s0 + $0x8] sm:$0xff]  ;;  %v324_v13 = vpack.c.bf16 %v55_v6, %v53_v1  ;;  %v52_v14 = vld [vmem:[%s692_s1 + $0x100] sm:$0xff]  ;;  %v54_v15 = vld [vmem:[%s692_s1 + $0x110] sm:$0xff]  ;;  %v371_v16 = vpack.c.bf16 %v98_v9, %v96_v8 }
  0x13   :  { %365 = vmatprep.subr.bf16.mxu0 %v364_v63  ;;  %190 = vmatprep.mubr.f32.mxu1 %v15_v11  ;;  %v57_v17 = vld [vmem:[%s692_s1 + $0x128] sm:$0xff]  ;;  %v59_v18 = vld [vmem:[%s692_s1 + $0x138] sm:$0xff]  ;;  %v326_v19 = vpack.c.bf16 %v54_v15, %v52_v14  ;;  %v56_v21 = vld [vmem:[%s692_s1 + $0x120] sm:$0xff]  ;;  %v103_v6 = vshrl.u32 %v102_v5, 7 }
  0x14   :  { %v328_v20 = vpack.c.bf16 %v59_v18, %v57_v17  ;;  %v58_v22 = vld [vmem:[%s692_s1 + $0x130] sm:$0xff]  ;;  %v61_v24 = vld [vmem:[%s692_s1 + $0x148] sm:$0xff]  ;;  %v63_v25 = vld [vmem:[%s692_s1 + $0x158] sm:$0xff] }
  0x15   :  { %311 = vmatpush1.bf16.msra.mxu1 %v310_v32  ;;  %v16_v23 = vld [vmem:[%s693_s0 + $0x10] sm:$0xff]  ;;  %v330_v26 = vpack.c.bf16 %v58_v22, %v56_v21  ;;  %v332_v27 = vpack.c.bf16 %v63_v25, %v61_v24  ;;  %v60_v28 = vld [vmem:[%s692_s1 + $0x140] sm:$0xff]  ;;  %v19_v30 = vld [vmem:[%s693_s0 + $0x28] sm:$0xff]  ;;  %v108_v9 = vsub.s32 1, %v103_v6 }
  0x16   :  { %313 = vmatprep.subr.bf16.mxu1 %v312_v35  ;;  %367 = vmatpush1.bf16.msra.mxu0 %v366_v2  ;;  %v62_v29 = vld [vmem:[%s692_s1 + $0x150] sm:$0xff]  ;;  %v65_v31 = vld [vmem:[%s692_s1 + $0x168] sm:$0xff]  ;;  %v67_v32 = vld [vmem:[%s692_s1 + $0x178] sm:$0xff] }
  0x17   :  { %370 = vmatprep.subr.msk.bf16.mxu0 %vm558_vm2, %v368_v7  ;;  %v334_v33 = vpack.c.bf16 %v62_v29, %v60_v28  ;;  %v336_v34 = vpack.c.bf16 %v67_v32, %v65_v31  ;;  %v66_v35 = vld [vmem:[%s692_s1 + $0x170] sm:$0xff]  ;;  %v69_v36 = vld [vmem:[%s692_s1 + $0x188] sm:$0xff]  ;;  %v71_v37 = vld [vmem:[%s692_s1 + $0x198] sm:$0xff]  ;;  %v104_v7 = vsub.s32 0, %v103_v6 }
  0x18   :  { %v340_v39 = vpack.c.bf16 %v71_v37, %v69_v36  ;;  %v68_v40 = vld [vmem:[%s692_s1 + $0x180] sm:$0xff]  ;;  %v70_v41 = vld [vmem:[%s692_s1 + $0x190] sm:$0xff]  ;;  %v73_v42 = vld [vmem:[%s692_s1 + $0x1a8] sm:$0xff] }
  0x19   :  { %315 = vmatpush1.bf16.msra.mxu1 %v314_v44  ;;  %v75_v43 = vld [vmem:[%s692_s1 + $0x1b8] sm:$0xff]  ;;  %v342_v44 = vpack.c.bf16 %v70_v41, %v68_v40  ;;  %v72_v46 = vld [vmem:[%s692_s1 + $0x1a0] sm:$0xff]  ;;  %v74_v47 = vld [vmem:[%s692_s1 + $0x1b0] sm:$0xff] }
  0x1a   :  { %317 = vmatprep.subr.bf16.mxu1 %v316_v48  ;;  %373 = vmatpush1.bf16.msk.msra.mxu0 %vm558_vm2, %v371_v16  ;;  %v344_v45 = vpack.c.bf16 %v75_v43, %v73_v42  ;;  %v77_v48 = vld [vmem:[%s692_s1 + $0x1c8] sm:$0xff]  ;;  %v79_v49 = vld [vmem:[%s692_s1 + $0x1d8] sm:$0xff]  ;;  %v346_v50 = vpack.c.bf16 %v74_v47, %v72_v46  ;;  %v76_v52 = vld [vmem:[%s692_s1 + $0x1c0] sm:$0xff] }
  0x1b   :  { %v348_v51 = vpack.c.bf16 %v79_v49, %v77_v48  ;;  %v78_v53 = vld [vmem:[%s692_s1 + $0x1d0] sm:$0xff]  ;;  %v81_v54 = vld [vmem:[%s692_s1 + $0x1e8] sm:$0xff]  ;;  %v83_v55 = vld [vmem:[%s692_s1 + $0x1f8] sm:$0xff] }
  0x1c   :  { %v350_v56 = vpack.c.bf16 %v78_v53, %v76_v52  ;;  %v352_v57 = vpack.c.bf16 %v83_v55, %v81_v54  ;;  %v80_v58 = vld [vmem:[%s692_s1 + $0x1e0] sm:$0xff]  ;;  %v82_v59 = vld [vmem:[%s692_s1 + $0x1f0] sm:$0xff]  ;;  %v17_v63 = vld [vmem:[%s693_s0 + $0x18] sm:$0xff] }
  0x1d   :  { %319 = vmatpush1.bf16.msra.mxu1 %v318_v60  ;;  %290 = vmatmul.mubr.msk.f32.vlgmr.msra.gmra.mrb[0].mxu0 %vm112_vm3, %v16_v23  ;;  %v354_v60 = vpack.c.bf16 %v82_v59, %v80_v58  ;;  %v14_v61 = vld [vmem:[%s693_s0] sm:$0xff] }
  0x1e   :  { %321 = vmatprep.subr.bf16.mxu1 %v320_v0  ;;  %273 = vmatprep.mubr.f32.mxu0 %v384_v3  ;;  %v64_v3 = vld [vmem:[%s692_s1 + $0x160] sm:$0xff] }
  0x1f   :  { %v338_v38 = vpack.c.bf16 %v66_v35, %v64_v3  ;;  %v18_v62 = vld [vmem:[%s693_s0 + $0x20] sm:$0xff] }
  0x20   :  { %v100_v8 = vld [vmem:[%s694_s2] sm:$0x3] }
  0x21   :  { %323 = vmatpush1.bf16.msra.mxu1 %v322_v12  ;;  %291 = vmatmul.mubr.msk.f32.gmra.mrb[2].mxu0 %vm112_vm3, %v19_v30  ;;  %v105_v10 = vrot.slane %v100_v8, %v104_v7  ;;  %v109_v11 = vrot.slane %v100_v8, %v108_v9 }
  0x22   :  { %325 = vmatprep.subr.bf16.mxu1 %v324_v13 }
  0x25   :  { %327 = vmatpush1.bf16.msra.mxu1 %v326_v19 }
  0x26   :  { %329 = vmatprep.subr.bf16.mxu1 %v328_v20 }
  0x29   :  { %331 = vmatpush1.bf16.msra.mxu1 %v330_v26 }
  0x2a   :  { %333 = vmatprep.subr.bf16.mxu1 %v332_v27 }
  0x2d   :  { %335 = vmatpush1.bf16.msra.mxu1 %v334_v33 }
  0x2e   :  { %337 = vmatprep.subr.bf16.mxu1 %v336_v34 }
  0x31   :  { %339 = vmatpush1.bf16.msra.mxu1 %v338_v38 }
  0x32   :  { %341 = vmatprep.subr.bf16.mxu1 %v340_v39 }
  0x35   :  { %343 = vmatpush1.bf16.msra.mxu1 %v342_v44 }
  0x36   :  { %345 = vmatprep.subr.bf16.mxu1 %v344_v45 }
  0x39   :  { %347 = vmatpush1.bf16.msra.mxu1 %v346_v50 }
  0x3a   :  { %349 = vmatprep.subr.bf16.mxu1 %v348_v51 }
  0x3d   :  { %351 = vmatpush1.bf16.msra.mxu1 %v350_v56 }
  0x3e   :  { %353 = vmatprep.subr.bf16.mxu1 %v352_v57 }
  0x41   :  { %355 = vmatpush1.bf16.msra.mxu1 %v354_v60 }
  0x44   :  { %191 = vmatmul.mubr.f32.vlgmr.msra.gmra.mrb[0].mxu1 %v14_v61 }
  0x45   :  { %196 = vmatprep.mubr.f32.mxu1 %v18_v62 }
  0x48   :  { %197 = vmatmul.mubr.f32.gmra.mrb[2].mxu1 %v17_v63 }
  0xf0   :  { %v269_v0 = vpop.f32.mrb[0].mxu0 }
  0xf1   :  { %v271_v1 = vpop.f32.mrb[1].mxu0 }
  0xf4   :  { %v275_v2 = vpop.f32.mrb[2].mxu0 }
  0xf5   :  { %v277_v4 = vpop.f32.mrb[3].mxu0 }
 0x117   :  { %v192_v12 = vpop.f32.mrb[0].mxu1 }
 0x118   :  { %v193_v13 = vadd.f32 %v192_v12, %v105_v10  ;;  %v194_v14 = vpop.f32.mrb[1].mxu1 }
 0x119   :  { %v195_v15 = vadd.f32 %v194_v14, %v109_v11 }
 0x11a   :  { %v270_v16 = vadd.f32 %v269_v0, %v193_v13 }
 0x11b   :  { %v272_v17 = vadd.f32 %v271_v1, %v195_v15  ;;  %v198_v18 = vpop.f32.mrb[2].mxu1 }
 0x11c   :  { %280 = vst [vmem:[%s695_s3] sm:$0xff] %v270_v16  ;;  %v199_v19 = vadd.f32 %v198_v18, %v105_v10  ;;  %v200_v20 = vpop.f32.mrb[3].mxu1 }
 0x11d   :  { %281 = vst [vmem:[%s695_s3 + $0x8] sm:$0xff] %v272_v17  ;;  %v201_v21 = vadd.f32 %v200_v20, %v109_v11 }
 0x11e   :  { %v276_v22 = vadd.f32 %v275_v2, %v199_v19 }
 0x11f   :  { %v278_v23 = vadd.f32 %v277_v4, %v201_v21 }
 0x120   :  { %282 = vst [vmem:[%s695_s3 + $0x10] sm:$0xff] %v276_v22 }
 0x121   :  { %283 = vst [vmem:[%s695_s3 + $0x18] sm:$0xff] %v278_v23 }

// kernel: seq_tagger_forward.5
= control target key start
LH: loop header
LB: loop body
LE: loop exit
PB: predicated region body
PF: predicated region fallthrough
CT: control target
= control target key end

     0   :  { %v818_v8 = vmov 0.0   ;;  %v820_v9 = vmov 0.0   ;;  %v822_v10 = vmov 0.0   ;;  %v824_v11 = vmov 0.0   ;;  %s932_s0 = inlined_call_operand.vmem [shape: f32[8,2,256], index: 0, kind: input, shape index: {}]   ;;  %s933_s1 = inlined_call_operand.vmem [shape: f32[32,128], index: 1, kind: input, shape index: {}]   ;;  %s934_s2 = inlined_call_operand.vmem [shape: f32[32,128], index: 2, kind: input, shape index: {}]   ;;  %s935_s3 = inlined_call_operand.vmem [shape: f32[32,128], index: 3, kind: input, shape index: {}]   ;;  %s936_s4 = inlined_call_operand.vmem [shape: f32[32,128], index: 4, kind: input, shape index: {}]   ;;  %s937_s5 = inlined_call_operand.vmem [shape: f32[1,128], index: 5, kind: input, shape index: {}]   ;;  %s938_s6 = inlined_call_operand.vmem [shape: f32[8,2,128], index: 6, kind: output, shape index: {}]  }
   0x1   :  { %v781_v0 = vld [vmem:[%s933_s1] sm:$0xff]  ;;  %v786_v1 = vld [vmem:[%s933_s1 + $0x8] sm:$0xff]  ;;  %v791_v2 = vld [vmem:[%s933_s1 + $0x10] sm:$0xff] }
   0x2   :  { %v796_v3 = vld [vmem:[%s933_s1 + $0x18] sm:$0xff]  ;;  %v801_v4 = vld [vmem:[%s934_s2] sm:$0xff]  ;;  %v806_v5 = vld [vmem:[%s934_s2 + $0x8] sm:$0xff]  ;;  %s826_s1 = smov 0  }
   0x3   :  { %v811_v6 = vld [vmem:[%s934_s2 + $0x10] sm:$0xff]  ;;  %v816_v7 = vld [vmem:[%s934_s2 + $0x18] sm:$0xff] }
   0x4 LB: > { %v49_v12 = vlaneseq  ;;  %v734_v13 = vmov 1983009808   ;;  %v735_v16 = vmov 0.0|0.0   ;;  %v590_v17 = vpack.c.bf16 %v786_v1, %v781_v0  ;;  %s738_s2 = smov 32   ;;  %s167_s13 = ssub.s32 7, %s728_s1  ;;  %s728_s1 = sphi %s826_s1, %s36_s1   ;;  %v724_v11 = vphi %v824_v11, %v152_v11   ;;  %v720_v10 = vphi %v822_v10, %v146_v10   ;;  %v716_v9 = vphi %v820_v9, %v281_v9   ;;  %v712_v8 = vphi %v818_v8, %v275_v8  }
   0x5   : > { %v47_v14 = vunpack.c.l.s4 %v734_v13  ;;  %589 = vmatprep.subr.bf16.mxu0 %v735_v16  ;;  %595 = vmatprep.subr.bf16.mxu1 %v735_v16  ;;  %v596_v18 = vpack.c.bf16 %v806_v5, %v801_v4  ;;  %v593_v20 = vpack.c.bf16 %v796_v3, %v791_v2  ;;  %v599_v21 = vpack.c.bf16 %v816_v7, %v811_v6  ;;  %s523_s14 = sshll.u32 %s728_s1, 2  ;;  %s524_s15 = sshll.u32 %s167_s13, 2 }
   0x6   : > { %v50_v15 = vshrl.u32 %v49_v12, 7  ;;  %591 = vmatpush3.bf16.msra.mxu0 %v590_v17  ;;  %vm736_vm0 = vmmov 0   ;;  %v737_v23 = vmov 0.0   ;;  %vm55_vm1 = vcmask 261120   ;;  %s43_s18 = scalar_lea.vmem %s932_s0, %s523_s14  ;;  %s170_s21 = scalar_lea.vmem %s932_s0, %s524_s15 }
   0x7   : > { %v48_v19 = vunpack.c.0.s8 %v47_v14  ;;  %597 = vmatpush3.bf16.msra.mxu1 %v596_v18  ;;  %592 = vmatprep.subr.bf16.mxu0 %v735_v16  ;;  %v44_v28 = vld [vmem:[%s43_s18] sm:$0xf]  ;;  %s739_s22 = smov 64   ;;  %s511_s23 = sshll.u32 %s728_s1, 1  ;;  %vm165_vm2 = vcmask 254976  }
   0x8   : > { %553 = vmatprep.mubr.msk.f32.mxu0 %vm736_vm0, %v737_v23  ;;  %598 = vmatprep.subr.bf16.mxu1 %v735_v16  ;;  %v171_v29 = vld [vmem:[%s170_s21] sm:$0xf]  ;;  %s515_s24 = sshll.u32 %s167_s13, 1  ;;  %s164_s25 = scalar_lea.vmem [#allocation2], %s511_s23 }
   0x9   : > { %v847_v22 = vsub.s32 %v48_v19, %v50_v15  ;;  %564 = vmatprep.mubr.msk.f32.mxu1 %vm736_vm0, %v737_v23  ;;  %v255_v33 = vrot.slane %v171_v29, 2  ;;  %s293_s26 = scalar_lea.vmem [#allocation3], %s515_s24  ;;  %s36_s1 = sadd.s32 1, %s728_s1  }
   0xa   : > { %594 = vmatpush3.bf16.msra.mxu0 %v593_v20  ;;  %p33_p0 = scmp.ge.s32.totalorder %s36_s1, 8  }
   0xb   : > { %v52_v24 = vrot.slane %v724_v11, %v847_v22  ;;  %600 = vmatpush3.bf16.msra.mxu1 %v599_v21  ;;  %v179_v25 = vrot.slane %v716_v9, %v847_v22  ;;  %v295_v63 = vld [vmem:[%s935_s3] sm:$0xff] (%p33_p0)  ;;  %v296_v12 = vld [vmem:[%s935_s3 + $0x8] sm:$0xff] (%p33_p0)  ;;  %v297_v13 = vld [vmem:[%s935_s3 + $0x10] sm:$0xff] (%p33_p0) }
   0xc   :  { %v298_v14 = vld [vmem:[%s935_s3 + $0x18] sm:$0xff] (%p33_p0)  ;;  %v300_v0 = vld [vmem:[%s936_s4 + $0x8] sm:$0xff] (%p33_p0)  ;;  %v301_v1 = vld [vmem:[%s936_s4 + $0x10] sm:$0xff] (%p33_p0)  ;;  %s918_s3 = smov (%p33_p0), 0  }
   0xd   : > { %53 = vrot.lane.b32.xlu0 %v52_v24, %s738_s2  ;;  %v302_v2 = vld [vmem:[%s936_s4 + $0x18] sm:$0xff] (%p33_p0)  ;;  %v522_v3 = vld [vmem:[%s937_s5] ss:$0 sm:$0xff] (%p33_p0) }
  0x11   : > { %180 = vrot.lane.b32.xlu0 %v179_v25, %s738_s2 }
  0x7f   : > { %v54_v26 = vpop.permute.xlu0 %53 }
  0x80   : > { %554 = vmatmul.mubr.msk.f32.vlgmr.msra.gmra.mrb[0].mxu0 %vm55_vm1, %v54_v26 }
  0x83   : > { %v181_v27 = vpop.permute.xlu0 %180 }
  0x84   : > { %565 = vmatmul.mubr.msk.f32.vlgmr.msra.gmra.mrb[0].mxu1 %vm55_vm1, %v181_v27 }
 0x153   : > { %v124_v30 = vpop.f32.mrb[0].mxu0 }
 0x154   : > { %v128_v31 = vadd.f32 %v124_v30, %v44_v28  ;;  %v555_v32 = vpop.f32.mrb[1].mxu0 }
 0x156   : > { %670 = vtanh.f32 %v128_v31  ;;  %v514_v39 = vmul.f32 -1.442695, %v128_v31 }
 0x157   : > { %v250_v34 = vpop.f32.mrb[0].mxu1 }
 0x158   : > { %v257_v35 = vadd.f32 %v255_v33, %v250_v34  ;;  %v566_v36 = vpop.f32.mrb[1].mxu1 }
 0x15a   : > { %672 = vtanh.f32 %v257_v35  ;;  %v518_v40 = vmul.f32 -1.442695, %v257_v35 }
 0x15b   : > { %674 = vpow2.f32 %v514_v39 }
 0x15c   : > { %676 = vpow2.f32 %v518_v40 }
 0x160   : > { %v671_v37 = vpop.eup %670 }
 0x161   : > { %138 = vrot.lane.b32.xlu1 %v671_v37, %s739_s22 }
 0x164   : > { %v673_v38 = vpop.eup %672 }
 0x165   : > { %267 = vrot.lane.b32.xlu1 %v673_v38, %s739_s22  ;;  %v675_v41 = vpop.eup %674 }
 0x166   : > { %v132_v42 = vadd.f32 1.0, %v675_v41  ;;  %v677_v43 = vpop.eup %676 }
 0x167   : > { %v261_v44 = vadd.f32 1.0, %v677_v43 }
 0x168   : > { %678 = vrcp.f32 %v132_v42 }
 0x169   : > { %680 = vrcp.f32 %v261_v44 }
 0x172   : > { %v679_v45 = vpop.eup %678 }
 0x173   : > { %v681_v48 = vpop.eup %680  ;;  %v136_v51 = vmul.f32 %v720_v10, %v679_v45 }
 0x174   : > { %v265_v53 = vmul.f32 %v712_v8, %v681_v48 }
 0x1d3   : > { %v139_v46 = vpop.permute.xlu1 %138 }
 0x1d4   : > { %v141_v47 = vmul.f32 %v679_v45, %v139_v46 }
 0x1d6   : > { %143 = vrot.lane.b32.xlu0 %v141_v47, %s738_s2 }
 0x1d7   : > { %v268_v49 = vpop.permute.xlu1 %267 }
 0x1d8   : > { %v270_v50 = vmul.f32 %v681_v48, %v268_v49 }
 0x1da   : > { %272 = vrot.lane.b32.xlu1 %v270_v50, %s738_s2 }
 0x248   : > { %v144_v52 = vpop.permute.xlu0 %143 }
 0x249   : > { %v146_v10 = vadd.f32 %v144_v52, %v136_v51  }
 0x24b   : > { %682 = vtanh.f32 %v146_v10 }
 0x24c   : > { %v273_v54 = vpop.permute.xlu1 %272 }
 0x24d   : > { %v275_v8 = vadd.f32 %v273_v54, %v265_v53  }
 0x24f   : > { %684 = vtanh.f32 %v275_v8 }
 0x255   : > { %v683_v55 = vpop.eup %682 }
 0x256   : > { %149 = vrot.lane.b32.xlu0 %v683_v55, %s739_s22 }
 0x259   : > { %v685_v56 = vpop.eup %684 }
 0x25a   : > { %278 = vrot.lane.b32.xlu1 %v685_v56, %s739_s22 }
 0x2c8   : > { %v150_v57 = vpop.permute.xlu0 %149 }
 0x2c9   : > { %v152_v11 = vmul.f32 %v679_v45, %v150_v57  }
 0x2cb   : > { %v160_v58 = vrot.slane %v152_v11, %v847_v22  ;;  %v299_v11 = vld [vmem:[%s936_s4] sm:$0xff] (%p33_p0) }
 0x2cc   : > { %v279_v59 = vpop.permute.xlu1 %278 }
 0x2cd   : > { %v281_v9 = vmul.f32 %v681_v48, %v279_v59   ;;  %161 = vrot.lane.b32.xlu0 %v160_v58, %s738_s2 }
 0x2cf   : > { %v289_v60 = vrot.slane %v281_v9, %v847_v22 }
 0x2d1   : > { %290 = vrot.lane.b32.xlu1 %v289_v60, %s738_s2 }
 0x33e   :  { %35 = sbr.rel (!%p33_p0) target bundleno = 4 (0x4), region = 65 }
 0x33f   : > { %v162_v61 = vpop.permute.xlu0 %161 }
 0x340   : > { %166 = vst.msk [vmem:[%s164_s25] sm:$0x3] %vm165_vm2, %v162_v61 }
 0x343   : > { %v291_v62 = vpop.permute.xlu1 %290 }
 0x344   : > { %294 = vst.msk [vmem:[%s293_s26] sm:$0x3] %vm165_vm2, %v291_v62 }
 0x345 LB: > { %v602_v4 = vpack.c.bf16 %v300_v0, %v299_v11  ;;  %v608_v5 = vpack.c.bf16 %v296_v12, %v295_v63  ;;  %v740_v6 = vmov 0.0|0.0   ;;  %v605_v7 = vpack.c.bf16 %v302_v2, %v301_v1  ;;  %s519_s4 = sshll.u32 %s732_s3, 1  ;;  %s309_s3 = sadd.s32 1, %s732_s3   ;;  %s732_s3 = sphi %s918_s3, %s309_s3  }
 0x346   : > { %601 = vmatprep.subr.bf16.mxu0 %v740_v6  ;;  %607 = vmatprep.subr.bf16.mxu1 %v740_v6  ;;  %v611_v8 = vpack.c.bf16 %v298_v14, %v297_v13  ;;  %vm741_vm3 = vmmov 0   ;;  %v742_v9 = vmov 0.0   ;;  %s313_s5 = scalar_lea.vmem [#allocation3], %s519_s4  ;;  %s311_s18 = scalar_lea.vmem [#allocation2], %s519_s4 }
 0x347   : > { %603 = vmatpush3.bf16.msra.mxu0 %v602_v4  ;;  %609 = vmatpush3.bf16.msra.mxu1 %v608_v5  ;;  %v312_v15 = vld [vmem:[%s311_s18] sm:$0x3]  ;;  %s469_s21 = scalar_lea.vmem %s938_s6, %s519_s4  ;;  %p306_p1 = scmp.ge.s32.totalorder %s309_s3, 8  }
 0x348   : > { %604 = vmatprep.subr.bf16.mxu0 %v740_v6  ;;  %610 = vmatprep.subr.bf16.mxu1 %v740_v6 }
 0x349   : > { %575 = vmatprep.mubr.msk.f32.mxu0 %vm741_vm3, %v742_v9  ;;  %586 = vmatprep.mubr.msk.f32.mxu1 %vm741_vm3, %v742_v9 }
 0x34b   : > { %606 = vmatpush3.bf16.msra.mxu0 %v605_v7  ;;  %612 = vmatpush3.bf16.msra.mxu1 %v611_v8  ;;  %v314_v10 = vld [vmem:[%s313_s5] sm:$0x3] }
 0x34e   : > { %576 = vmatmul.mubr.msk.f32.vlgmr.msra.gmra.mrb[0].mxu0 %vm55_vm1, %v314_v10  ;;  %587 = vmatmul.mubr.msk.f32.vlgmr.msra.gmra.mrb[0].mxu1 %vm55_vm1, %v312_v15 }
 0x420   :  { %308 = sbr.rel (!%p306_p1) target bundleno = 837 (0x345), region = 76 }
 0x421   : > { %v385_v16 = vpop.f32.mrb[0].mxu0  ;;  %v458_v17 = vpop.f32.mrb[0].mxu1 }
 0x422   : > { %v459_v18 = vadd.f32 %v458_v17, %v385_v16  ;;  %v577_v19 = vpop.f32.mrb[1].mxu0  ;;  %v588_v20 = vpop.f32.mrb[1].mxu1 }
 0x424   : > { %v468_v21 = vadd.f32 %v522_v3, %v459_v18 }
 0x426   : > { %470 = vst [vmem:[%s469_s21] sm:$0x3] %v468_v21 }

</bundles_post_ra>
